<compile_context>
chip_gen: v7x
topology: tpu7x:2x2x1
jax: 0.10.0
libtpu: 0.0.40
codegen_flags: <defaults>
</compile_context>

<pallas_src>
import jax
import jax.numpy as jnp
from jax import lax
from jax.experimental import pallas as pl
from jax.experimental.pallas import tpu as pltpu


def _round_up(x, m):
    return (x + m - 1) // m * m


def _pick_tile(dim, max_tile, align):
    """Pick a layout-legal tile size for one dimension.

    If the whole dim fits under max_tile, use the full dim (a block equal to
    the full array dim is always legal, aligned or not). Otherwise use the
    largest multiple of `align` that fits; the resulting pl.cdiv grid gets a
    masked boundary tile instead of requiring a padded HBM copy.
    """
    if dim <= max_tile:
        return dim
    return min(dim, max(align, (max_tile // align) * align))


def _vmem_capacity_bytes():
    try:
        info = pltpu.get_tpu_info()
        cap = int(getattr(info, "vmem_capacity_bytes", 0))
        if cap > 0:
            return cap
    except Exception:
        pass
    return 64 * 1024 * 1024  # conservative fallback (v7x per-core VMEM)


# x[M, D] . w[N, D] contracting on the shared D axis -> [M, N]
# (no transpose materialized; the MXU consumes both operands directly)
_CONTRACT_D = (((1,), (1,)), ((), ()))


def _dyn_kernel(x_ref, dynw_ref, o_ref):
    # x_ref:    (1, S, D)       resident across the vocab-tile axis (same block)
    # dynw_ref: (1, TILE_N, D)  this batch's current dynamic-vocab tile
    # o_ref:    (1, S, TILE_N)
    o_ref[0] = lax.dot_general(
        x_ref[0], dynw_ref[0], dimension_numbers=_CONTRACT_D,
        preferred_element_type=jnp.float32).astype(o_ref.dtype)


def _static_kernel(x_ref, w_ref, o_ref):
    # x_ref: (TILE_M, D); w_ref: (TILE_O, D); o_ref: (TILE_M, TILE_O)
    o_ref[...] = lax.dot_general(
        x_ref[...], w_ref[...], dimension_numbers=_CONTRACT_D,
        preferred_element_type=jnp.float32).astype(o_ref.dtype)


def dynamic_linear(x, dyn_weights, weight=None, *, input_syntax_voc=False,
                   compute_dtype=None, split_output=False,
                   max_tile_n=2048, max_tile_o=2048, max_tile_m=512):
    """Pallas implementation of DynamicLinear.forward.

    x:           (B, S, D)
    dyn_weights: (B, V, D)
    weight:      (O, D)   required when input_syntax_voc=False
    returns:     (B, S, V) if input_syntax_voc else (B, S, O+V)
                 (or (static, dyn) tuple when split_output=True)
    """
    B, S, D = x.shape
    _, V, _ = dyn_weights.shape
    out_dtype = x.dtype

    if compute_dtype is not None:
        # e.g. jnp.bfloat16: halves the dominant dyn_weights HBM stream,
        # accumulation below stays f32 via preferred_element_type.
        x = x.astype(compute_dtype)
        dyn_weights = dyn_weights.astype(compute_dtype)
        if weight is not None:
            weight = weight.astype(compute_dtype)
    in_item = jnp.dtype(x.dtype).itemsize
    out_item = jnp.dtype(out_dtype).itemsize

    # ---- generation-aware VMEM budget -> tile sizes ------------------------
    cap = _vmem_capacity_bytes()
    vmem_limit = int(min(cap * 3 // 4, 96 * 1024 * 1024))  # 96 MiB v5e/v6e, 48 MiB v7x
    tile_budget = vmem_limit - (8 << 20)                    # headroom for Mosaic scratch

    # Lane/sublane-padded extents, used only for budget arithmetic.
    d_lanes = _round_up(D, 128)
    s_sub = _round_up(S, 8)

    # Dynamic-vocab streaming kernel: double-buffered x block, dynw tile, out tile.
    fixed = 2 * s_sub * d_lanes * in_item
    per_col = 2 * d_lanes * in_item + 2 * s_sub * out_item
    budget_tile_n = max(128, (tile_budget - fixed) // per_col)
    tile_n = _pick_tile(V, min(max_tile_n, budget_tile_n), 128)

    grid_dyn = (B, pl.cdiv(V, tile_n))
    dyn_cost = pl.CostEstimate(
        flops=2 * B * S * V * D, transcendentals=0,
        bytes_accessed=in_item * (B * S * D + B * V * D) + out_item * B * S * V)
    dyn_logits = pl.pallas_call(
        _dyn_kernel,
        out_shape=jax.ShapeDtypeStruct((B, S, V), out_dtype),
        grid_spec=pltpu.PrefetchScalarGridSpec(
            num_scalar_prefetch=0,
            grid=grid_dyn,
            in_specs=[
                pl.BlockSpec((1, S, D), lambda b, j: (b, 0, 0)),
                # TODO(synk): if an xprof trace shows exposed DMA between grid
                # steps (tiny S), add pipeline_mode=pl.Buffered(3) here.
                pl.BlockSpec((1, tile_n, D), lambda b, j: (b, j, 0)),
            ],
            out_specs=pl.BlockSpec((1, S, tile_n), lambda b, j: (b, 0, j)),
        ),
        compiler_params=pltpu.CompilerParams(
            dimension_semantics=("parallel", "parallel"),
            vmem_limit_bytes=vmem_limit),
        cost_estimate=dyn_cost,
    )(x, dyn_weights)

    if input_syntax_voc:
        return dyn_logits

    assert weight is not None, "static weight required when input_syntax_voc=False"
    O = weight.shape[0]
    M = B * S

    # Hoisted static matmul: one tall (B*S, D) x (O, D)^T matmul shared across
    # the whole batch (better MXU fill, no per-(batch, tile) recompute).
    tile_m = _pick_tile(M, max_tile_m, 8)
    fixed_s = 2 * _round_up(tile_m, 8) * d_lanes * in_item
    per_o = 2 * d_lanes * in_item + 2 * _round_up(tile_m, 8) * out_item
    budget_tile_o = max(128, (tile_budget - fixed_s) // per_o)
    tile_o = _pick_tile(O, min(max_tile_o, budget_tile_o), 128)

    grid_stat = (pl.cdiv(M, tile_m), pl.cdiv(O, tile_o))
    stat_cost = pl.CostEstimate(
        flops=2 * M * O * D, transcendentals=0,
        bytes_accessed=in_item * (M * D + grid_stat[0] * O * D) + out_item * M * O)
    static_logits = pl.pallas_call(
        _static_kernel,
        out_shape=jax.ShapeDtypeStruct((M, O), out_dtype),
        grid_spec=pltpu.PrefetchScalarGridSpec(
            num_scalar_prefetch=0,
            grid=grid_stat,
            in_specs=[
                pl.BlockSpec((tile_m, D), lambda i, j: (i, 0)),
                pl.BlockSpec((tile_o, D), lambda i, j: (j, 0)),
            ],
            out_specs=pl.BlockSpec((tile_m, tile_o), lambda i, j: (i, j)),
        ),
        compiler_params=pltpu.CompilerParams(
            dimension_semantics=("parallel", "parallel"),
            vmem_limit_bytes=vmem_limit),
        cost_estimate=stat_cost,
    )(x.reshape(M, D), weight).reshape(B, S, O)

    if split_output:
        # Lets the consumer fuse the column concat with whatever follows
        # (e.g. softmax) and skip an output-sized HBM round trip.
        return static_logits, dyn_logits
    # Module-parity single tensor: [static | dynamic] columns.
    return jnp.concatenate([static_logits, dyn_logits], axis=-1)


def _reference(x, dyn_weights, weight, input_syntax_voc):
    # Pure-JAX reference mirroring the PyTorch per-batch loop.
    outs = []
    for b in range(x.shape[0]):
        if input_syntax_voc:
            w_b = dyn_weights[b]
        else:
            w_b = jnp.concatenate([weight, dyn_weights[b]], axis=0)
        outs.append(jnp.matmul(x[b], w_b.T, precision=lax.Precision.HIGHEST))
    return jnp.stack(outs)


if __name__ == "__main__":
    key = jax.random.PRNGKey(0)
    k_x, k_w, k_dw, k_x2, k_w2, k_dw2 = jax.random.split(key, 6)

    # Small shapes consistent with the module: batch=2, seq=8, in_features=32,
    # static out_features=16, dynamic vocab size V=8.
    B, S, D = 2, 8, 32
    O, V = 16, 8

    x = jax.random.normal(k_x, (B, S, D), dtype=jnp.float32)
    dyn_weights = jax.random.normal(k_dw, (B, V, D), dtype=jnp.float32)
    limit = (6.0 / (O + D)) ** 0.5
    weight = jax.random.uniform(k_w, (O, D), minval=-limit, maxval=limit,
                                dtype=jnp.float32)

    # Branch 1: input_syntax_voc = False (concat static + dynamic weights).
    out_cat = dynamic_linear(x, dyn_weights, weight, input_syntax_voc=False)
    jax.block_until_ready(out_cat)
    ref_cat = _reference(x, dyn_weights, weight, False)
    assert out_cat.shape == (B, S, O + V)
    assert jnp.allclose(out_cat, ref_cat, atol=1e-4, rtol=1e-4)

    # Branch 2: input_syntax_voc = True (dynamic weights only).
    out_dyn = dynamic_linear(x, dyn_weights, input_syntax_voc=True)
    jax.block_until_ready(out_dyn)
    ref_dyn = _reference(x, dyn_weights, weight, True)
    assert out_dyn.shape == (B, S, V)
    assert jnp.allclose(out_dyn, ref_dyn, atol=1e-4, rtol=1e-4)

    # Multi-tile path with forced small tiles: exercises the cdiv grids and
    # the masked boundary tiles when V / O are not multiples of the tile width.
    B2, S2, D2 = 2, 8, 128
    O2, V2 = 160, 200
    x2 = jax.random.normal(k_x2, (B2, S2, D2), dtype=jnp.float32)
    dw2 = jax.random.normal(k_dw2, (B2, V2, D2), dtype=jnp.float32)
    w2 = jax.random.normal(k_w2, (O2, D2), dtype=jnp.float32) * 0.05
    out2 = dynamic_linear(x2, dw2, w2, input_syntax_voc=False,
                          max_tile_n=128, max_tile_o=128, max_tile_m=8)
    jax.block_until_ready(out2)
    ref2 = _reference(x2, dw2, w2, False)
    assert out2.shape == (B2, S2, O2 + V2)
    assert jnp.allclose(out2, ref2, atol=5e-2, rtol=1e-2)

    print("KERNEL_OK")
</pallas_src>

<mosaic_0001>
module attributes {stable_mosaic.version = 11 : i64} {
  func.func @_dyn_kernel(%arg0: i32, %arg1: i32, %arg2: memref<1x8x32xf32, #tpu.memory_space<vmem>>, %arg3: memref<1x8x32xf32, #tpu.memory_space<vmem>>, %arg4: memref<1x8x8xf32, #tpu.memory_space<vmem>>) attributes {dimension_semantics = [#tpu.dimension_semantics<parallel>, #tpu.dimension_semantics<parallel>], iteration_bounds = array<i64: 2, 1>, scalar_prefetch = 0 : i64, scratch_operands = 0 : i64, tpu.core_type = #tpu.core_type<tc>, window_params = [{transform_indices = @transform_0, window_bounds = array<i64: 1, 8, 32>}, {transform_indices = @transform_1, window_bounds = array<i64: 1, 8, 32>}, {transform_indices = @transform_2, window_bounds = array<i64: 1, 8, 8>}]} {
    %c0 = arith.constant 0 : index
    %c0_0 = arith.constant 0 : index
    %c0_1 = arith.constant 0 : index
    %0 = vector.load %arg2[%c0, %c0_0, %c0_1] : memref<1x8x32xf32, #tpu.memory_space<vmem>>, vector<1x8x32xf32>
    %1 = vector.shape_cast %0 : vector<1x8x32xf32> to vector<8x32xf32>
    %c0_2 = arith.constant 0 : index
    %c0_3 = arith.constant 0 : index
    %c0_4 = arith.constant 0 : index
    %2 = vector.load %arg3[%c0_2, %c0_3, %c0_4] : memref<1x8x32xf32, #tpu.memory_space<vmem>>, vector<1x8x32xf32>
    %3 = vector.shape_cast %2 : vector<1x8x32xf32> to vector<8x32xf32>
    %cst = arith.constant dense<0.000000e+00> : vector<8x8xf32>
    %4 = tpu.matmul %1, %3, %cst {dimension_numbers = #tpu.dot_dimension_numbers<[1], [1], [0], [0], [0, 0, 1, 0], [], []>} : vector<8x32xf32>, vector<8x32xf32>, vector<8x8xf32> -> vector<8x8xf32>
    %c0_5 = arith.constant 0 : index
    %c0_6 = arith.constant 0 : index
    %c0_7 = arith.constant 0 : index
    %5 = vector.load %arg4[%c0_5, %c0_6, %c0_7] : memref<1x8x8xf32, #tpu.memory_space<vmem>>, vector<1x8x8xf32>
    %6 = vector.shape_cast %5 : vector<1x8x8xf32> to vector<8x8xf32>
    %7 = vector.shape_cast %4 : vector<8x8xf32> to vector<1x8x8xf32>
    tpu.vector_store %arg4[%c0_5, %c0_6, %c0_7], %7 {strides = array<i32>} : memref<1x8x8xf32, #tpu.memory_space<vmem>>, vector<1x8x8xf32>,
    return
  }
  func.func @transform_0(%arg0: i32, %arg1: i32) -> (i32, i32, i32) {
    %c0_i32 = arith.constant 0 : i32
    %c0_i32_0 = arith.constant 0 : i32
    %c0_i32_1 = arith.constant 0 : i32
    return %arg0, %c0_i32, %c0_i32_0 : i32, i32, i32
  }
  func.func @transform_1(%arg0: i32, %arg1: i32) -> (i32, i32, i32) {
    %c0_i32 = arith.constant 0 : i32
    %c0_i32_0 = arith.constant 0 : i32
    return %arg0, %arg1, %c0_i32 : i32, i32, i32
  }
  func.func @transform_2(%arg0: i32, %arg1: i32) -> (i32, i32, i32) {
    %c0_i32 = arith.constant 0 : i32
    %c0_i32_0 = arith.constant 0 : i32
    return %arg0, %c0_i32, %arg1 : i32, i32, i32
  }
}

</mosaic_0001>

<bundles_post_ra>
// kernel: tpu_custom_call.1
= control target key start
LH: loop header
LB: loop body
LE: loop exit
PB: predicated region body
PF: predicated region fallthrough
CT: control target
= control target key end

     0   :  { %7 = vsyncpa [#allocation3], 0  ;;  %s894_s0 = inlined_call_operand.hbm [shape: f32[2,8,32], index: 0, kind: input, shape index: {}]   ;;  %s895_s1 = inlined_call_operand.hbm [shape: f32[2,8,32], index: 1, kind: input, shape index: {}]   ;;  %s896_s2 = inlined_call_operand.hbm [shape: f32[2,8,8], index: 2, kind: output, shape index: {}]  }
   0x1   :  { %9 = vsyncpa [#allocation3 + $0x1], 0 }
   0x2   :  { %10 = vsyncpa [#allocation6], 0 }
   0x3   :  { %12 = vsyncpa [#allocation6 + $0x1], 0 }
   0x4   :  { %13 = vsyncpa [#allocation4], 0 }
   0x5   :  { %15 = vsyncpa [#allocation4 + $0x1], 0  ;;  %s674_s9 = smov 0   ;;  %s676_s10 = smov 0  }
   0x6   :  { %s678_s11 = smov 0   ;;  %s680_s12 = smov 0  }
   0x7   :  { %s682_s13 = smov 0   ;;  %s684_s14 = smov 0  }
   0x8 LB: > { %s412_s15 = sadd.s32 4294967295, %s652_s14   ;;  %s413_s16 = sadd.s32 4294967294, %s652_s14   ;;  %s652_s14 = sphi %s684_s14, %s21_s14   ;;  %s648_s13 = sphi %s682_s13, %s916_s13   ;;  %s644_s12 = sphi %s680_s12, %s915_s12   ;;  %s640_s11 = sphi %s678_s11, %s914_s11   ;;  %s636_s10 = sphi %s676_s10, %s913_s10   ;;  %s632_s9 = sphi %s674_s9, %s912_s9  }
   0x9   : > { %s33_s17 = sadd.s32 1, %s648_s13  ;;  %s40_s18 = sadd.s32 1, %s640_s11 }
   0xa   : > { %p35_p0 = scmp.ge.s32.totalorder %s33_s17, 2  ;;  %p47_p1 = scmp.ne.s32.totalorder %s640_s11, %s636_s10 }
   0xb   : > { %p48_p2 = scmp.eq.s32.totalorder %s652_s14, 0  ;;  %p53_p3 = scmp.ne.s32.totalorder %s636_s10, %s632_s9 }
   0xc   : > { %s918_s17 = smov (%p35_p0, %s33_s17), 0  ;;  %p54_p5 = scmp.eq.s32.totalorder %s412_s15, 0 }
   0xd   : > { %p715_p4 = por %p48_p2, %p47_p1  ;;  %s37_s20 = ssub.s32 %s648_s13, %s918_s17 }
   0xe   : > { %p107_p6 = scmp.eq.s32.totalorder %s412_s15, 1  ;;  %p38_p7 = scmp.eq.s32.totalorder %s37_s20, 0 }
   0xf   : > { %p721_p8 = por %p54_p5, %p53_p3  ;;  %p113_p10 = scmp.eq.s32.totalorder %s413_s16, 1 }
  0x10   : > { %p725_p9 = por %p107_p6, %p47_p1  ;;  %p454_p13 = scmp.lt.s32.totalorder %s652_s14, 2 }
  0x11   : > { %s900_s21 = scalar_select %p721_p8, 1, 0 }
  0x12   : > { %s901_s22 = scalar_select %p725_p9, 1, 0 }
  0x13   : > { %s730_s23 = scalar_select %p38_p7, %s640_s11, %s40_s18  }
  0x14   : > { %p732_p11 = por %p113_p10, %p53_p3  ;;  %s739_s25 = sand.u32 1, %s640_s11  }
  0x15   : > { %s416_s26 = sshll.u32 %s739_s25, 3  ;;  %s417_s27 = sshll.u32 %s648_s13, 7 }
  0x16   : > { %s902_s24 = scalar_select %p732_p11, 1, 0 }
  0x17   : > { %s748_s30 = scalar_lea.hbm %s894_s0, %s417_s27  ;;  %s137_s3 = scalar_lea.vmem [#allocation2], %s416_s26 }
  0x18   : > { %s144_s4 = sshll.u32 %s137_s3, 4  ;;  %p756_p0 = pnand %p454_p13, %p715_p4  ;;  %s752_s4 = int_to_ptr.vmem [resolvable:$true] %s144_s4 }
  0x19   : > { %s134_s6 = scalar_lea.sflag [#allocation3], %s739_s25  ;;  %s506_s7 = scalar_lea.hbm %s748_s30, 128 }
  0x1a   : > { %p507_p3 = scmp.ne.s32.totalorder %s748_s30, %s506_s7  ;;  %p508_p5 = pneg %p756_p0 }
  0x1b   : > { %s511_s16 = scalar_lea.hbm %s894_s0, 256  ;;  %p512_p4 = scmp.lt.u32.totalorder %s748_s30, %s894_s0 }
  0x1c   : > { %p509_p6 = pnand %p508_p5, %p507_p3  ;;  %p513_p10 = scmp.lt.u32.totalorder %s511_s16, %s506_s7 }
  0x1d   : > { %p515_p12 = scmp.lt.u32.totalorder %s506_s7, %s748_s30 }
  0x1e   : > { %p510_p7 = pneg %p509_p6  ;;  %p514_p13 = por %p513_p10, %p512_p4 }
  0x20   : > { %p516_p1 = por %p515_p12, %p514_p13 }
  0x22   : > { %p517_p2 = pnand %p516_p1, %p510_p7 }
  0x24   : > { %520 = shalt.err (!%p517_p2)
}
  0x25   : > { %s521_s20 = scalar_lea.vmem %s752_s4, 128  ;;  %s654_s28 = smov [#allocation2]  }
  0x26   : > { %p522_p3 = scmp.ne.s32.totalorder %s752_s4, %s521_s20  ;;  %s526_s29 = sshll.u32 %s654_s28, 4  ;;  %s527_s29 = int_to_ptr.vmem [resolvable:$false] %s526_s29 }
  0x27   : > { %s528_s3 = scalar_lea.vmem %s527_s29, 256  ;;  %p529_p9 = scmp.lt.s32.totalorder %s752_s4, %s527_s29 }
  0x28   : > { %p524_p6 = pnand %p522_p3, %p508_p5  ;;  %p530_p4 = scmp.lt.s32.totalorder %s528_s3, %s521_s20 }
  0x2a   : > { %p525_p11 = pneg %p524_p6  ;;  %p531_p10 = por %p530_p4, %p529_p9 }
  0x2c   : > { %p532_p12 = pnand %p531_p10, %p525_p11 }
  0x2e   : > { %535 = shalt.err (!%p532_p12)
}
  0x2f   : > { %446 = dma.hbm_to_vmem [thread:$0]  (!%p756_p0), %s748_s30, 128, %s752_s4, %s134_s6  }
  0x30   : > { %p904_p1 = scmp.lt.s32.totalorder %s652_s14, 3  ;;  %p905_p2 = scmp.ge.s32.totalorder %s652_s14, 1 }
  0x31   : > { %s801_s16 = scalar_lea.hbm %s895_s1, %s417_s27  ;;  %s155_s18 = scalar_lea.vmem [#allocation5], %s416_s26 }
  0x32   : > { %p792_p7 = pnand %p905_p2, %p904_p1  ;;  %s163_s19 = sshll.u32 %s155_s18, 4  ;;  %s164_s19 = int_to_ptr.vmem [resolvable:$true] %s163_s19 }
  0x33   : > { %s152_s30 = scalar_lea.sflag [#allocation6], %s739_s25  ;;  %s536_s4 = scalar_lea.hbm %s801_s16, 128 }
  0x34   : > { %s906_s7 = scalar_select %p792_p7, 1, 0 }
  0x35   : > { %p537_p9 = scmp.ne.s32.totalorder %s801_s16, %s536_s4  ;;  %s541_s27 = scalar_lea.hbm %s895_s1, 256 }
  0x36   : > { %p542_p3 = scmp.lt.u32.totalorder %s801_s16, %s895_s1  ;;  %p543_p6 = scmp.lt.u32.totalorder %s541_s27, %s536_s4 }
  0x37   : > { %p539_p11 = pnand %p537_p9, %p508_p5  ;;  %p545_p10 = scmp.lt.u32.totalorder %s536_s4, %s801_s16 }
  0x38   : > { %p544_p4 = por %p543_p6, %p542_p3 }
  0x39   : > { %p540_p13 = pneg %p539_p11 }
  0x3a   : > { %p546_p12 = por %p545_p10, %p544_p4 }
  0x3c   : > { %p547_p1 = pnand %p546_p12, %p540_p13 }
  0x3e   : > { %550 = shalt.err (!%p547_p1)
}
  0x3f   : > { %s551_s25 = scalar_lea.vmem %s164_s19, 128  ;;  %s655_s26 = smov [#allocation5]  }
  0x40   : > { %p552_p2 = scmp.ne.s32.totalorder %s164_s19, %s551_s25  ;;  %s556_s3 = sshll.u32 %s655_s26, 4  ;;  %s557_s3 = int_to_ptr.vmem [resolvable:$false] %s556_s3 }
  0x41   : > { %s558_s8 = scalar_lea.vmem %s557_s3, 256  ;;  %p559_p8 = scmp.lt.s32.totalorder %s164_s19, %s557_s3 }
  0x42   : > { %p554_p9 = pnand %p552_p2, %p508_p5  ;;  %p560_p7 = scmp.lt.s32.totalorder %s558_s8, %s551_s25 }
  0x44   : > { %p555_p11 = pneg %p554_p9  ;;  %p561_p3 = por %p560_p7, %p559_p8 }
  0x46   : > { %p562_p6 = pnand %p561_p3, %p555_p11 }
  0x48   : > { %565 = shalt.err (!%p562_p6)
}
  0x49   : > { %449 = dma.hbm_to_vmem [thread:$0]  (!%p756_p0), %s801_s16, 128, %s164_s19, %s152_s30  }
  0x4a   : > { %p907_p13 = scmp.ne.s32.totalorder %s906_s7, 0 }
  0x4b   : > { %s828_s15 = sand.u32 (!%p907_p13), 1, %s636_s10   ;;  %p908_p5 = scmp.ne.s32.totalorder (!%p907_p13), %s900_s21, 0 }
  0x4c   : > { %172 = sbr.rel (%p907_p13) target bundleno = 317 (0x13d), region = 28  ;;  %s421_s18 = sshll.u32 (!%p907_p13), %s828_s15, 3 }
  0x4d   : > { %s175_s4 = scalar_lea.sflag (!%p907_p13), [#allocation3], %s828_s15  ;;  %s178_s6 = scalar_lea.vmem (!%p907_p13), [#allocation2], %s421_s18 }
  0x53   : > { %619 = dma.done.wait (%p908_p5), %s175_s4, 128  }
  0x54   : > { %621 = vsyncadd (%p908_p5), %s175_s4, 4294967168  ;;  %s184_s5 = scalar_lea.sflag [#allocation6], %s828_s15  ;;  %s187_s16 = scalar_lea.vmem [#allocation5], %s421_s18 }
  0x55   : > { %623 = dma.done.wait (%p908_p5), %s184_s5, 128  }
  0x56   : > { %625 = vsyncadd (%p908_p5), %s184_s5, 4294967168  ;;  %v656_v0 = vmov 0.0   ;;  %vm657_vm0 = vmmov 0   ;;  %vm215_vm1 = vcmask 261120   ;;  %v214_v1 = vld [vmem:[%s187_s16] sm:$0xff]  ;;  %v213_v2 = vld [vmem:[%s178_s6] sm:$0xff] }
  0x57   : > { %432 = vmatprep.subr.mxu0 %v656_v0  ;;  %434 = vmatprep.mubr.msk.f32.mxu0 %vm657_vm0, %v656_v0  ;;  %s427_s7 = sshll.u32 %s644_s12, 7  ;;  %s212_s19 = scalar_lea.vmem [#allocation7], %s421_s18  ;;  %vm292_vm2 = vcmask 64512  }
  0x58   : > { %433 = vmatpush3.xpose.msk.msra.mxu0 %vm215_vm1, %v214_v1  ;;  %s309_s30 = sshll.u32 %s212_s19, 4  ;;  %s845_s21 = scalar_lea.hbm %s896_s2, %s427_s7  ;;  %s847_s30 = int_to_ptr.vmem [resolvable:$true] %s309_s30 }
  0x59   : > { %s295_s28 = scalar_lea.sflag [#allocation4], %s828_s15  ;;  %s566_s29 = scalar_lea.vmem %s847_s30, 128 }
  0x5a   : > { %p567_p8 = scmp.ne.s32.totalorder %s847_s30, %s566_s29  ;;  %p909_p0 = scmp.ne.s32.totalorder %s901_s22, 0 }
  0x5b   : > { %435 = vmatmul.mubr.msk.f32.vlgmr.msra.gmra.mrb[0].mxu0 %vm215_vm1, %v213_v2  ;;  %s658_s12 = smov [#allocation7]  }
  0x5c   : > { %p568_p7 = pnand %p567_p8, %p909_p0  ;;  %s570_s25 = sshll.u32 %s658_s12, 4  ;;  %s571_s25 = int_to_ptr.vmem [resolvable:$false] %s570_s25 }
  0x5d   : > { %s572_s26 = scalar_lea.vmem %s571_s25, 256  ;;  %p573_p10 = scmp.lt.s32.totalorder %s847_s30, %s571_s25 }
  0x5e   : > { %p569_p4 = pneg %p568_p7  ;;  %p574_p12 = scmp.lt.s32.totalorder %s572_s26, %s566_s29 }
  0x60   : > { %p575_p1 = por %p574_p12, %p573_p10 }
  0x62   : > { %p576_p2 = pnand %p575_p1, %p569_p4 }
 0x12e   : > { %v288_v3 = vpop.f32.mrb[0].mxu0 }
 0x12f   : > { %293 = vst.msk [vmem:[%s212_s19] sm:$0xff] %vm292_vm2, %v288_v3  ;;  %v436_v4 = vpop.f32.mrb[1].mxu0 }
 0x130   : > { %579 = shalt.err (!%p576_p2)
}
 0x131   : > { %s580_s3 = scalar_lea.hbm %s845_s21, 128  ;;  %s584_s18 = scalar_lea.hbm %s896_s2, 256 }
 0x132   : > { %p581_p9 = scmp.ne.s32.totalorder %s845_s21, %s580_s3  ;;  %p585_p6 = scmp.lt.u32.totalorder %s845_s21, %s896_s2 }
 0x133   : > { %p586_p13 = scmp.lt.u32.totalorder %s584_s18, %s580_s3  ;;  %p588_p8 = scmp.lt.u32.totalorder %s580_s3, %s845_s21 }
 0x134   : > { %p582_p11 = pnand %p581_p9, %p909_p0 }
 0x135   : > { %p587_p5 = por %p586_p13, %p585_p6 }
 0x136   : > { %p583_p3 = pneg %p582_p11 }
 0x137   : > { %p589_p7 = por %p588_p8, %p587_p5 }
 0x139   : > { %p590_p4 = pnand %p589_p7, %p583_p3 }
 0x13b   : > { %593 = shalt.err (!%p590_p4)
}
 0x13c   : > { %441 = dma.vmem_to_hbm [thread:$0]  (%p909_p0), %s847_s30, 128, %s845_s21, %s295_s28  }
 0x13d PF: > { %s321_s5 = sand.u32 1, %s632_s9   ;;  %p910_p10 = scmp.ne.s32.totalorder %s902_s24, 0 }
 0x13e   : > { %p911_p12 = scmp.ge.s32.totalorder %s652_s14, 2  ;;  %s322_s16 = scalar_lea.sflag [#allocation4], %s321_s5 }
 0x140   : > { %p451_p1 = pnand %p911_p12, %p910_p10 }
 0x142   : > { %627 = dma.done.wait (!%p451_p1), %s322_s16, 128  }
 0x143   : > { %629 = vsyncadd (!%p451_p1), %s322_s16, 4294967168  ;;  %s21_s14 = sadd.s32 1, %s652_s14   ;;  %s912_s9 = smov %s636_s10 }
 0x144   : > { %p18_p2 = scmp.ge.s32.totalorder %s21_s14, 4   ;;  %s913_s10 = smov %s640_s11 }
 0x145   : > { %s914_s11 = smov %s730_s23  ;;  %s915_s12 = smov %s648_s13 }
 0x146   : > { %s916_s13 = smov %s918_s17  ;;  %20 = sbr.rel (!%p18_p2) target bundleno = 8 (0x8), region = 86 }
 0x14d   :  { %327 = vsyncpa [#allocation3], 1 }
 0x14e   :  { %329 = vsyncpa [#allocation3 + $0x1], 1 }
 0x14f   :  { %330 = vsyncpa [#allocation6], 1 }
 0x150   :  { %332 = vsyncpa [#allocation6 + $0x1], 1 }
 0x151   :  { %333 = vsyncpa [#allocation4], 1 }
 0x152   :  { %335 = vsyncpa [#allocation4 + $0x1], 1 }

</bundles_post_ra>
